<compile_context>
chip_gen: v7x
topology: tpu7x:2x2x1
jax: 0.10.0
libtpu: 0.0.40
codegen_flags: <defaults>
</compile_context>

<pallas_src>
import jax
import jax.numpy as jnp
from jax.experimental import pallas as pl
from jax.experimental.pallas import tpu as pltpu


def _round_up(v, m):
    return (v + m - 1) // m * m


def _vmem_budget_bytes():
    """~75% of physical VMEM; conservative 64 MiB fallback (v7x) if query fails."""
    cap = 64 * 1024 * 1024
    try:
        info = pltpu.get_tpu_info()
        cap = int(getattr(info, "vmem_capacity_bytes", cap))
    except Exception:
        pass
    return (cap * 3) // 4


# ----------------------------------------------------------------------------
# Fused tiled GEMM kernel:  out = gelu((x @ w) + shift)    (bf16 in, f32 acc)
# ----------------------------------------------------------------------------
def pallas_matmul_shift_gelu(x, w, shift, *, out_dtype=jnp.float32,
                             gelu=True, tk_cap=2048):
    """x:(M,K), w:(K,N), shift:(N,). Returns (M,N) in out_dtype."""
    M, K = x.shape
    Kw, N = w.shape
    assert Kw == K

    budget = _vmem_budget_bytes()

    # --- padded problem sizes: lane-dense K and N ----------------------------
    Kp = _round_up(K, 128)
    Np = _round_up(N, 128)

    # --- tile selection -------------------------------------------------------
    tn = 256 if Np % 256 == 0 else 128       # fill the 256-wide MXU when possible
    tk = Kp if Kp <= tk_cap else 1024        # single K step when K is small
    gk = Kp // tk

    bx, bw, bo = 2, 2, jnp.dtype(out_dtype).itemsize
    tm = min(_round_up(M, 16), 1024)         # large M tiles amortize grid-step cost

    def footprint(tm_):
        f = 2 * (tm_ * tk * bx + tk * tn * bw + tm_ * tn * bo) + 2 * 2 * tn * 4
        if gk > 1:
            f += tm_ * tn * 4                # f32 accumulator scratch
        return f

    while tm > 16 and footprint(tm) > budget:
        tm = _round_up(tm // 2, 16)
    Mp = _round_up(M, tm)

    # --- pad operands (zeros are numerically free) ----------------------------
    xb = x.astype(jnp.bfloat16)
    wb = w.astype(jnp.bfloat16)
    if Mp != M or Kp != K:
        xb = jnp.pad(xb, ((0, Mp - M), (0, Kp - K)))
    if Kp != K or Np != N:
        wb = jnp.pad(wb, ((0, Kp - K), (0, Np - N)))
    sh = jnp.pad(shift.astype(jnp.float32), (0, Np - N)).reshape(1, Np)

    gm, gn = Mp // tm, Np // tn

    def epilogue(acc, sh_blk, o_ref):
        y = acc + sh_blk
        if gelu:
            y = jax.nn.gelu(y, approximate=True)   # tanh GELU -> EUP slot
        o_ref[...] = y.astype(o_ref.dtype)

    if gk == 1:
        # Single K step: no accumulator scratch, no init/finalize phases.
        def kernel(x_ref, w_ref, sh_ref, o_ref):
            acc = jnp.dot(x_ref[...], w_ref[...],
                          preferred_element_type=jnp.float32)
            epilogue(acc, sh_ref[...], o_ref)

        grid = (gm, gn)
        in_specs = [
            pl.BlockSpec((tm, tk), lambda i, j: (i, 0)),
            pl.BlockSpec((tk, tn), lambda i, j: (0, j)),
            pl.BlockSpec((1, tn), lambda i, j: (0, j)),
        ]
        out_spec = pl.BlockSpec((tm, tn), lambda i, j: (i, j))
        scratch = []
        dims = ("parallel", "parallel")
    else:
        def kernel(x_ref, w_ref, sh_ref, o_ref, acc_ref):
            k = pl.program_id(2)
            part = jnp.dot(x_ref[...], w_ref[...],
                           preferred_element_type=jnp.float32)

            @pl.when(k == 0)
            def _():
                acc_ref[...] = part            # first step assigns (no zero-fill)

            @pl.when(k != 0)
            def _():
                acc_ref[...] += part

            @pl.when(k == pl.num_programs(2) - 1)
            def _():
                epilogue(acc_ref[...], sh_ref[...], o_ref)

        grid = (gm, gn, gk)
        in_specs = [
            pl.BlockSpec((tm, tk), lambda i, j, k: (i, k)),
            pl.BlockSpec((tk, tn), lambda i, j, k: (k, j)),
            pl.BlockSpec((1, tn), lambda i, j, k: (0, j)),
        ]
        out_spec = pl.BlockSpec((tm, tn), lambda i, j, k: (i, j))
        scratch = [pltpu.VMEM((tm, tn), jnp.float32)]
        dims = ("parallel", "parallel", "arbitrary")

    out = pl.pallas_call(
        kernel,
        out_shape=jax.ShapeDtypeStruct((Mp, Np), out_dtype),
        grid_spec=pltpu.PrefetchScalarGridSpec(
            num_scalar_prefetch=0,
            grid=grid,
            in_specs=in_specs,
            out_specs=out_spec,
            scratch_shapes=scratch,
        ),
        compiler_params=pltpu.CompilerParams(
            dimension_semantics=dims,
            vmem_limit_bytes=budget,
        ),
    )(xb, wb, sh)

    return out[:M, :N]                           # unconditional M/N un-padding


# ----------------------------------------------------------------------------
# Conv2d(3x3, stride 2, pad 1) + folded BN + GELU  via im2col + fused GEMM
# ----------------------------------------------------------------------------
def conv3x3_s2_bn_gelu(x_nhwc, w_hwio, scale, shift, *, out_dtype=jnp.float32):
    """x:(B,H,W,Cin) NHWC, w:(3,3,Cin,Cout), scale/shift:(Cout,). -> (B,Ho,Wo,Cout)"""
    B, H, W, Cin = x_nhwc.shape
    Cout = w_hwio.shape[-1]
    Ho = (H - 1) // 2 + 1
    Wo = (W - 1) // 2 + 1

    # TODO(synk): fuse the im2col window expansion into the Pallas kernel
    # (halo-block DMA + 9 shifted dots) so patches are never materialized in HBM;
    # mitigated here by building the patches directly in bf16 (half the bytes).
    xp = jnp.pad(x_nhwc, ((0, 0), (1, 1), (1, 1), (0, 0)))
    cols = [xp[:, dy:dy + 2 * Ho - 1:2, dx:dx + 2 * Wo - 1:2, :]
            for dy in range(3) for dx in range(3)]
    patches = jnp.concatenate(cols, axis=-1).reshape(B * Ho * Wo, 9 * Cin)
    patches = patches.astype(jnp.bfloat16)

    # Fold the BN scale into the weights (one-time KxN scaling at trace time).
    w2d = (w_hwio.reshape(9 * Cin, Cout).astype(jnp.float32)
           * scale[None, :].astype(jnp.float32))

    y = pallas_matmul_shift_gelu(patches, w2d, shift, out_dtype=out_dtype)
    return y.reshape(B, Ho, Wo, Cout)


def _fold_bn(conv_b, gamma, beta, mean, var, eps=1e-5):
    """Fold conv bias + eval-mode BatchNorm into per-channel scale/shift."""
    scale = gamma * jax.lax.rsqrt(var + eps)
    shift = beta - mean * scale + conv_b * scale
    return scale, shift


# ----------------------------------------------------------------------------
# PatchEmbed forward (Pallas path)
# ----------------------------------------------------------------------------
def patch_embed_forward(x_nchw, p):
    x = jnp.transpose(x_nchw, (0, 2, 3, 1))          # NCHW -> NHWC
    w1 = jnp.transpose(p['w1'], (2, 3, 1, 0))        # OIHW -> HWIO
    w2 = jnp.transpose(p['w2'], (2, 3, 1, 0))
    s1, t1 = _fold_bn(p['b1'], p['bn1_g'], p['bn1_b'], p['bn1_m'], p['bn1_v'])
    s2, t2 = _fold_bn(p['b2'], p['bn2_g'], p['bn2_b'], p['bn2_m'], p['bn2_v'])

    # Stage-1 output kept in bf16: halves inter-stage HBM traffic and the
    # stage-2 im2col read bytes (the GEMM consumes bf16 anyway).
    y = conv3x3_s2_bn_gelu(x, w1, s1, t1, out_dtype=jnp.bfloat16)   # proj1+norm1+GELU
    y = conv3x3_s2_bn_gelu(y, w2, s2, t2, out_dtype=jnp.float32)    # proj2+norm2+GELU

    B, Ho, Wo, D = y.shape
    # flatten(2).transpose(1,2): tokens row-major over (Ho, Wo) -> (B, Ho*Wo, D)
    return y.reshape(B, Ho * Wo, D)


# ----------------------------------------------------------------------------
# Pure-JAX f32 reference (exact-erf GELU, no Pallas) for verification
# ----------------------------------------------------------------------------
def ref_patch_embed(x_nchw, p, eps=1e-5):
    def stage(x, w, b, g, be, m, v):
        y = jax.lax.conv_general_dilated(
            x, w, window_strides=(2, 2), padding=((1, 1), (1, 1)),
            dimension_numbers=('NCHW', 'OIHW', 'NCHW'))
        y = y + b[None, :, None, None]
        y = (y - m[None, :, None, None]) * jax.lax.rsqrt(v[None, :, None, None] + eps)
        y = y * g[None, :, None, None] + be[None, :, None, None]
        return jax.nn.gelu(y, approximate=False)

    y = stage(x_nchw, p['w1'], p['b1'], p['bn1_g'], p['bn1_b'], p['bn1_m'], p['bn1_v'])
    y = stage(y, p['w2'], p['b2'], p['bn2_g'], p['bn2_b'], p['bn2_m'], p['bn2_v'])
    B, D, Ho, Wo = y.shape
    return jnp.transpose(y.reshape(B, D, Ho * Wo), (0, 2, 1))


# ----------------------------------------------------------------------------
# Deterministic parameter initialization
# ----------------------------------------------------------------------------
def init_params(key, in_ch, embed_dim):
    ks = iter(jax.random.split(key, 16))

    def nrm(shape, s=0.05):
        return (jax.random.normal(next(ks), shape) * s).astype(jnp.float32)

    def bn(n):
        g = (1.0 + 0.1 * jax.random.normal(next(ks), (n,))).astype(jnp.float32)
        b = (0.1 * jax.random.normal(next(ks), (n,))).astype(jnp.float32)
        m = (0.1 * jax.random.normal(next(ks), (n,))).astype(jnp.float32)
        v = (jnp.abs(jax.random.normal(next(ks), (n,))) * 0.1 + 0.5).astype(jnp.float32)
        return g, b, m, v

    p = {}
    p['w1'] = nrm((embed_dim, in_ch, 3, 3))       # OIHW (PyTorch layout)
    p['b1'] = nrm((embed_dim,))
    p['bn1_g'], p['bn1_b'], p['bn1_m'], p['bn1_v'] = bn(embed_dim)
    p['w2'] = nrm((embed_dim, embed_dim, 3, 3))
    p['b2'] = nrm((embed_dim,))
    p['bn2_g'], p['bn2_b'], p['bn2_m'], p['bn2_v'] = bn(embed_dim)
    return p


# ----------------------------------------------------------------------------
if __name__ == "__main__":
    # Small config: img 16x16, in_channels=3, patch_size=4 (two stride-2 convs), embed_dim=64
    B, Cin, H, W = 2, 3, 16, 16
    embed_dim, patch = 64, 4

    key = jax.random.PRNGKey(0)
    k_in, k_par = jax.random.split(key)
    x = jax.random.normal(k_in, (B, Cin, H, W), dtype=jnp.float32)
    params = init_params(k_par, Cin, embed_dim)

    fwd_pallas = jax.jit(patch_embed_forward)
    fwd_ref = jax.jit(ref_patch_embed)

    out = jax.block_until_ready(fwd_pallas(x, params))
    ref = jax.block_until_ready(fwd_ref(x, params))

    assert out.shape == (B, (H // patch) * (W // patch), embed_dim)
    # bf16 MXU inputs + bf16 inter-stage activation + tanh-GELU epilogue:
    # compare against the f32 / exact-erf reference at a bf16-appropriate tolerance.
    assert jnp.allclose(out, ref, atol=3e-2, rtol=3e-2), \
        float(jnp.max(jnp.abs(out - ref)))
    print("KERNEL_OK")
</pallas_src>

<mosaic_0001>
module attributes {stable_mosaic.version = 11 : i64} {
  func.func @kernel(%arg0: i32, %arg1: i32, %arg2: memref<128x128xbf16, #tpu.memory_space<vmem>>, %arg3: memref<128x128xbf16, #tpu.memory_space<vmem>>, %arg4: memref<1x128xf32, #tpu.memory_space<vmem>>, %arg5: memref<128x128xbf16, #tpu.memory_space<vmem>>) attributes {dimension_semantics = [#tpu.dimension_semantics<parallel>, #tpu.dimension_semantics<parallel>], iteration_bounds = array<i64: 1, 1>, scalar_prefetch = 0 : i64, scratch_operands = 0 : i64, tpu.core_type = #tpu.core_type<tc>, window_params = [{transform_indices = @transform_0, window_bounds = array<i64: 128, 128>}, {transform_indices = @transform_1, window_bounds = array<i64: 128, 128>}, {transform_indices = @transform_2, window_bounds = array<i64: 1, 128>}, {transform_indices = @transform_3, window_bounds = array<i64: 128, 128>}]} {
    %c0 = arith.constant 0 : index
    %c0_0 = arith.constant 0 : index
    %0 = vector.load %arg2[%c0, %c0_0] : memref<128x128xbf16, #tpu.memory_space<vmem>>, vector<128x128xbf16>
    %c0_1 = arith.constant 0 : index
    %c0_2 = arith.constant 0 : index
    %1 = vector.load %arg3[%c0_1, %c0_2] : memref<128x128xbf16, #tpu.memory_space<vmem>>, vector<128x128xbf16>
    %cst = arith.constant dense<0.000000e+00> : vector<128x128xf32>
    %2 = tpu.matmul %0, %1, %cst {dimension_numbers = #tpu.dot_dimension_numbers<[1], [0], [0], [1], [0, 0, 1, 1], [], []>} : vector<128x128xbf16>, vector<128x128xbf16>, vector<128x128xf32> -> vector<128x128xf32>
    %c0_3 = arith.constant 0 : index
    %c0_4 = arith.constant 0 : index
    %3 = vector.load %arg4[%c0_3, %c0_4] : memref<1x128xf32, #tpu.memory_space<vmem>>, vector<1x128xf32>
    %4 = vector.broadcast %3 : vector<1x128xf32> to vector<128x128xf32>
    %5 = arith.addf %2, %4 : vector<128x128xf32>
    %6 = arith.mulf %5, %5 : vector<128x128xf32>
    %7 = arith.mulf %5, %6 : vector<128x128xf32>
    %cst_5 = arith.constant 4.471500e-02 : f32
    %8 = vector.broadcast %cst_5 : f32 to vector<128x128xf32>
    %9 = arith.mulf %8, %7 : vector<128x128xf32>
    %10 = arith.addf %5, %9 : vector<128x128xf32>
    %cst_6 = arith.constant 0.797884583 : f32
    %11 = vector.broadcast %cst_6 : f32 to vector<128x128xf32>
    %12 = arith.mulf %11, %10 : vector<128x128xf32>
    %13 = math.tanh %12 : vector<128x128xf32>
    %cst_7 = arith.constant 1.000000e+00 : f32
    %14 = vector.broadcast %cst_7 : f32 to vector<128x128xf32>
    %15 = arith.addf %14, %13 : vector<128x128xf32>
    %cst_8 = arith.constant 5.000000e-01 : f32
    %16 = vector.broadcast %cst_8 : f32 to vector<128x128xf32>
    %17 = arith.mulf %16, %15 : vector<128x128xf32>
    %18 = arith.mulf %5, %17 : vector<128x128xf32>
    %19 = arith.truncf %18 : vector<128x128xf32> to vector<128x128xbf16>
    %c0_9 = arith.constant 0 : index
    %c0_10 = arith.constant 0 : index
    %20 = vector.load %arg5[%c0_9, %c0_10] : memref<128x128xbf16, #tpu.memory_space<vmem>>, vector<128x128xbf16>
    tpu.vector_store %arg5[%c0_9, %c0_10], %19 {strides = array<i32>} : memref<128x128xbf16, #tpu.memory_space<vmem>>, vector<128x128xbf16>,
    return
  }
  func.func @transform_0(%arg0: i32, %arg1: i32) -> (i32, i32) {
    %c0_i32 = arith.constant 0 : i32
    %c0_i32_0 = arith.constant 0 : i32
    return %arg0, %c0_i32 : i32, i32
  }
  func.func @transform_1(%arg0: i32, %arg1: i32) -> (i32, i32) {
    %c0_i32 = arith.constant 0 : i32
    %c0_i32_0 = arith.constant 0 : i32
    return %c0_i32, %arg1 : i32, i32
  }
  func.func @transform_2(%arg0: i32, %arg1: i32) -> (i32, i32) {
    %c0_i32 = arith.constant 0 : i32
    %c0_i32_0 = arith.constant 0 : i32
    return %c0_i32, %arg1 : i32, i32
  }
  func.func @transform_3(%arg0: i32, %arg1: i32) -> (i32, i32) {
    %c0_i32 = arith.constant 0 : i32
    return %arg0, %arg1 : i32, i32
  }
}

module attributes {stable_mosaic.version = 11 : i64} {
  func.func @kernel(%arg0: i32, %arg1: i32, %arg2: memref<32x640xbf16, #tpu.memory_space<vmem>>, %arg3: memref<640x128xbf16, #tpu.memory_space<vmem>>, %arg4: memref<1x128xf32, #tpu.memory_space<vmem>>, %arg5: memref<32x128xf32, #tpu.memory_space<vmem>>) attributes {dimension_semantics = [#tpu.dimension_semantics<parallel>, #tpu.dimension_semantics<parallel>], iteration_bounds = array<i64: 1, 1>, scalar_prefetch = 0 : i64, scratch_operands = 0 : i64, tpu.core_type = #tpu.core_type<tc>, window_params = [{transform_indices = @transform_0, window_bounds = array<i64: 32, 640>}, {transform_indices = @transform_1, window_bounds = array<i64: 640, 128>}, {transform_indices = @transform_2, window_bounds = array<i64: 1, 128>}, {transform_indices = @transform_3, window_bounds = array<i64: 32, 128>}]} {
    %c0 = arith.constant 0 : index
    %c0_0 = arith.constant 0 : index
    %0 = vector.load %arg2[%c0, %c0_0] : memref<32x640xbf16, #tpu.memory_space<vmem>>, vector<32x640xbf16>
    %c0_1 = arith.constant 0 : index
    %c0_2 = arith.constant 0 : index
    %1 = vector.load %arg3[%c0_1, %c0_2] : memref<640x128xbf16, #tpu.memory_space<vmem>>, vector<640x128xbf16>
    %cst = arith.constant dense<0.000000e+00> : vector<32x128xf32>
    %2 = tpu.matmul %0, %1, %cst {dimension_numbers = #tpu.dot_dimension_numbers<[1], [0], [0], [1], [0, 0, 1, 1], [], []>} : vector<32x640xbf16>, vector<640x128xbf16>, vector<32x128xf32> -> vector<32x128xf32>
    %c0_3 = arith.constant 0 : index
    %c0_4 = arith.constant 0 : index
    %3 = vector.load %arg4[%c0_3, %c0_4] : memref<1x128xf32, #tpu.memory_space<vmem>>, vector<1x128xf32>
    %4 = vector.broadcast %3 : vector<1x128xf32> to vector<32x128xf32>
    %5 = arith.addf %2, %4 : vector<32x128xf32>
    %6 = arith.mulf %5, %5 : vector<32x128xf32>
    %7 = arith.mulf %5, %6 : vector<32x128xf32>
    %cst_5 = arith.constant 4.471500e-02 : f32
    %8 = vector.broadcast %cst_5 : f32 to vector<32x128xf32>
    %9 = arith.mulf %8, %7 : vector<32x128xf32>
    %10 = arith.addf %5, %9 : vector<32x128xf32>
    %cst_6 = arith.constant 0.797884583 : f32
    %11 = vector.broadcast %cst_6 : f32 to vector<32x128xf32>
    %12 = arith.mulf %11, %10 : vector<32x128xf32>
    %13 = math.tanh %12 : vector<32x128xf32>
    %cst_7 = arith.constant 1.000000e+00 : f32
    %14 = vector.broadcast %cst_7 : f32 to vector<32x128xf32>
    %15 = arith.addf %14, %13 : vector<32x128xf32>
    %cst_8 = arith.constant 5.000000e-01 : f32
    %16 = vector.broadcast %cst_8 : f32 to vector<32x128xf32>
    %17 = arith.mulf %16, %15 : vector<32x128xf32>
    %18 = arith.mulf %5, %17 : vector<32x128xf32>
    %c0_9 = arith.constant 0 : index
    %c0_10 = arith.constant 0 : index
    %19 = vector.load %arg5[%c0_9, %c0_10] : memref<32x128xf32, #tpu.memory_space<vmem>>, vector<32x128xf32>
    tpu.vector_store %arg5[%c0_9, %c0_10], %18 {strides = array<i32>} : memref<32x128xf32, #tpu.memory_space<vmem>>, vector<32x128xf32>,
    return
  }
  func.func @transform_0(%arg0: i32, %arg1: i32) -> (i32, i32) {
    %c0_i32 = arith.constant 0 : i32
    %c0_i32_0 = arith.constant 0 : i32
    return %arg0, %c0_i32 : i32, i32
  }
  func.func @transform_1(%arg0: i32, %arg1: i32) -> (i32, i32) {
    %c0_i32 = arith.constant 0 : i32
    %c0_i32_0 = arith.constant 0 : i32
    return %c0_i32, %arg1 : i32, i32
  }
  func.func @transform_2(%arg0: i32, %arg1: i32) -> (i32, i32) {
    %c0_i32 = arith.constant 0 : i32
    %c0_i32_0 = arith.constant 0 : i32
    return %c0_i32, %arg1 : i32, i32
  }
  func.func @transform_3(%arg0: i32, %arg1: i32) -> (i32, i32) {
    %c0_i32 = arith.constant 0 : i32
    return %arg0, %arg1 : i32, i32
  }
}

</mosaic_0001>

<bundles_post_ra>
// kernel: patch_embed_forward.2
= control target key start
LH: loop header
LB: loop body
LE: loop exit
PB: predicated region body
PF: predicated region fallthrough
CT: control target
= control target key end

     0   :  { %s911_s1 = inlined_call_operand.vmem [shape: bf16[128,128], index: 1, kind: input, shape index: {}]   ;;  %s912_s0 = inlined_call_operand.vmem [shape: bf16[128,128], index: 0, kind: input, shape index: {}]   ;;  %s913_s2 = inlined_call_operand.vmem [shape: f32[1,128], index: 2, kind: input, shape index: {}]   ;;  %s914_s3 = inlined_call_operand.vmem [shape: bf16[128,128], index: 3, kind: output, shape index: {}]  }
   0x1   :  { %v635_v0 = vld [vmem:[%s911_s1] sm:$0xff]   ;;  %v636_v1 = vld [vmem:[%s911_s1 + $0x8] sm:$0xff]   ;;  %v637_v2 = vld [vmem:[%s911_s1 + $0x10] sm:$0xff]  }
   0x2   :  { %587 = vmatprep.subr.bf16.mxu0 %v635_v0  ;;  %619 = vmatprep.subr.bf16.mxu1 %v635_v0  ;;  %v638_v3 = vld [vmem:[%s911_s1 + $0x18] sm:$0xff]   ;;  %v643_v4 = vld [vmem:[%s912_s0] sm:$0xff]   ;;  %v640_v7 = vld [vmem:[%s911_s1 + $0x28] sm:$0xff]  }
   0x3   :  { %588 = vmatpush3.bf16.msra.mxu0 %v635_v0  ;;  %627 = vmatpush3.bf16.msra.mxu1 %v635_v0  ;;  %v644_v5 = vld [vmem:[%s912_s0 + $0x20] sm:$0xff]   ;;  %v641_v8 = vld [vmem:[%s911_s1 + $0x30] sm:$0xff]   ;;  %v642_v9 = vld [vmem:[%s911_s1 + $0x38] sm:$0xff]  }
   0x4   :  { %589 = vmatprep.subr.bf16.mxu0 %v636_v1  ;;  %620 = vmatprep.subr.bf16.mxu1 %v636_v1  ;;  %v639_v6 = vld [vmem:[%s911_s1 + $0x20] sm:$0xff]   ;;  %v645_v10 = vld [vmem:[%s912_s0 + $0x8] sm:$0xff]   ;;  %v647_v12 = vld [vmem:[%s912_s0 + $0x10] sm:$0xff]  }
   0x5   :  { %603 = vmatprep.mubr.bf16.mxu0 %v643_v4  ;;  %611 = vmatprep.mubr.bf16.mxu1 %v644_v5  ;;  %v646_v11 = vld [vmem:[%s912_s0 + $0x28] sm:$0xff]   ;;  %v648_v13 = vld [vmem:[%s912_s0 + $0x30] sm:$0xff]   ;;  %v649_v14 = vld [vmem:[%s912_s0 + $0x18] sm:$0xff]  }
   0x6   :  { %v650_v15 = vld [vmem:[%s912_s0 + $0x38] sm:$0xff]   ;;  %v754_v16 = vld [vmem:[%s913_s2] ss:$0 sm:$0xff] }
   0x7   :  { %590 = vmatpush3.bf16.msra.mxu0 %v636_v1  ;;  %628 = vmatpush3.bf16.msra.mxu1 %v636_v1 }
   0x8   :  { %591 = vmatprep.subr.bf16.mxu0 %v637_v2  ;;  %621 = vmatprep.subr.bf16.mxu1 %v637_v2 }
   0xb   :  { %592 = vmatpush3.bf16.msra.mxu0 %v637_v2  ;;  %629 = vmatpush3.bf16.msra.mxu1 %v637_v2 }
   0xc   :  { %593 = vmatprep.subr.bf16.mxu0 %v638_v3  ;;  %622 = vmatprep.subr.bf16.mxu1 %v638_v3 }
   0xf   :  { %594 = vmatpush3.bf16.msra.mxu0 %v638_v3  ;;  %630 = vmatpush3.bf16.msra.mxu1 %v638_v3 }
  0x10   :  { %595 = vmatprep.subr.bf16.mxu0 %v639_v6  ;;  %623 = vmatprep.subr.bf16.mxu1 %v639_v6 }
  0x13   :  { %596 = vmatpush3.bf16.msra.mxu0 %v639_v6  ;;  %631 = vmatpush3.bf16.msra.mxu1 %v639_v6 }
  0x14   :  { %597 = vmatprep.subr.bf16.mxu0 %v640_v7  ;;  %624 = vmatprep.subr.bf16.mxu1 %v640_v7 }
  0x17   :  { %598 = vmatpush3.bf16.msra.mxu0 %v640_v7  ;;  %632 = vmatpush3.bf16.msra.mxu1 %v640_v7 }
  0x18   :  { %599 = vmatprep.subr.bf16.mxu0 %v641_v8  ;;  %625 = vmatprep.subr.bf16.mxu1 %v641_v8 }
  0x1b   :  { %600 = vmatpush3.bf16.msra.mxu0 %v641_v8  ;;  %633 = vmatpush3.bf16.msra.mxu1 %v641_v8 }
  0x1c   :  { %601 = vmatprep.subr.bf16.mxu0 %v642_v9  ;;  %626 = vmatprep.subr.bf16.mxu1 %v642_v9 }
  0x1f   :  { %602 = vmatpush3.bf16.msra.mxu0 %v642_v9  ;;  %634 = vmatpush3.bf16.msra.mxu1 %v642_v9 }
  0x22   :  { %604 = vmatmul.mubr.bf16.vlgmr.msra.gmra.mrb[0].mxu0 %v645_v10  ;;  %612 = vmatmul.mubr.bf16.vlgmr.msra.gmra.mrb[0].mxu1 %v646_v11 }
  0x23   :  { %607 = vmatprep.mubr.bf16.mxu0 %v647_v12  ;;  %615 = vmatprep.mubr.bf16.mxu1 %v648_v13 }
  0x2a   :  { %608 = vmatmul.mubr.bf16.gmra.mrb[4].mxu0 %v649_v14  ;;  %616 = vmatmul.mubr.bf16.gmra.mrb[4].mxu1 %v650_v15 }
  0xf5   :  { %v605_v17 = vpop.f32.mrb[0].mxu0  ;;  %v613_v18 = vpop.f32.mrb[0].mxu1 }
  0xf6   :  { %v757_v19 = vadd.f32 %v605_v17, %v754_v16  ;;  %v760_v20 = vadd.f32 %v613_v18, %v754_v16  ;;  %v184_v21 = vpop.f32.mrb[1].mxu0  ;;  %v216_v22 = vpop.f32.mrb[1].mxu1 }
  0xf7   :  { %v763_v23 = vadd.f32 %v754_v16, %v184_v21  ;;  %v766_v24 = vadd.f32 %v754_v16, %v216_v22  ;;  %v606_v25 = vpop.f32.mrb[2].mxu0  ;;  %v614_v26 = vpop.f32.mrb[2].mxu1 }
  0xf8   :  { %v249_v27 = vmul.f32 %v757_v19, %v757_v19  ;;  %v257_v28 = vmul.f32 %v760_v20, %v760_v20  ;;  %v773_v29 = vadd.f32 %v606_v25, %v754_v16  ;;  %v776_v30 = vadd.f32 %v614_v26, %v754_v16  ;;  %v187_v31 = vpop.f32.mrb[3].mxu0  ;;  %v219_v32 = vpop.f32.mrb[3].mxu1 }
  0xf9   :  { %v247_v33 = vmul.f32 %v763_v23, %v763_v23  ;;  %v255_v34 = vmul.f32 %v766_v24, %v766_v24  ;;  %v783_v35 = vadd.f32 %v754_v16, %v187_v31  ;;  %v786_v36 = vadd.f32 %v754_v16, %v219_v32 }
  0xfa   :  { %v265_v37 = vmul.f32 %v249_v27, %v757_v19  ;;  %v273_v38 = vmul.f32 %v257_v28, %v760_v20  ;;  %v250_v39 = vmul.f32 %v773_v29, %v773_v29  ;;  %v258_v40 = vmul.f32 %v776_v30, %v776_v30 }
  0xfb   :  { %v263_v41 = vmul.f32 %v247_v33, %v763_v23  ;;  %v271_v42 = vmul.f32 %v255_v34, %v766_v24  ;;  %v248_v43 = vmul.f32 %v783_v35, %v783_v35  ;;  %v256_v44 = vmul.f32 %v786_v36, %v786_v36 }
  0xfc   :  { %v281_v45 = vmul.f32 0.044715, %v265_v37  ;;  %v289_v46 = vmul.f32 0.044715, %v273_v38  ;;  %v266_v47 = vmul.f32 %v250_v39, %v773_v29  ;;  %v274_v48 = vmul.f32 %v258_v40, %v776_v30 }
  0xfd   :  { %v279_v49 = vmul.f32 0.044715, %v263_v41  ;;  %v287_v50 = vmul.f32 0.044715, %v271_v42  ;;  %v264_v51 = vmul.f32 %v248_v43, %v783_v35  ;;  %v272_v52 = vmul.f32 %v256_v44, %v786_v36  ;;  %v609_v53 = vpop.f32.mrb[4].mxu0  ;;  %v617_v54 = vpop.f32.mrb[4].mxu1 }
  0xfe   :  { %v297_v55 = vadd.f32 %v281_v45, %v757_v19  ;;  %v305_v56 = vadd.f32 %v289_v46, %v760_v20  ;;  %v282_v57 = vmul.f32 0.044715, %v266_v47  ;;  %v290_v58 = vmul.f32 0.044715, %v274_v48  ;;  %v200_v59 = vpop.f32.mrb[5].mxu0  ;;  %v232_v60 = vpop.f32.mrb[5].mxu1 }
  0xff   :  { %v295_v61 = vadd.f32 %v279_v49, %v763_v23  ;;  %v303_v62 = vadd.f32 %v287_v50, %v766_v24  ;;  %v280_v63 = vmul.f32 0.044715, %v264_v51  ;;  %v288_v0 = vmul.f32 0.044715, %v272_v52  ;;  %v610_v1 = vpop.f32.mrb[6].mxu0  ;;  %v618_v2 = vpop.f32.mrb[6].mxu1 }
 0x100   :  { %v313_v3 = vmul.f32 0.7978846, %v297_v55  ;;  %v321_v4 = vmul.f32 0.7978846, %v305_v56  ;;  %v298_v5 = vadd.f32 %v282_v57, %v773_v29  ;;  %v306_v6 = vadd.f32 %v290_v58, %v776_v30  ;;  %v203_v7 = vpop.f32.mrb[7].mxu0  ;;  %v810_v8 = vpop.f32.mrb[7].mxu1 }
 0x101   :  { %v311_v9 = vmul.f32 0.7978846, %v295_v61  ;;  %v319_v10 = vmul.f32 0.7978846, %v303_v62  ;;  %v296_v11 = vadd.f32 %v280_v63, %v783_v35  ;;  %v304_v12 = vadd.f32 %v288_v0, %v786_v36 }
 0x102   :  { %651 = vtanh.f32 %v313_v3  ;;  %v314_v13 = vmul.f32 0.7978846, %v298_v5  ;;  %v322_v14 = vmul.f32 0.7978846, %v306_v6  ;;  %v815_v15 = vadd.f32 %v609_v53, %v754_v16 }
 0x103   :  { %653 = vtanh.f32 %v321_v4  ;;  %v312_v17 = vmul.f32 0.7978846, %v296_v11  ;;  %v320_v18 = vmul.f32 0.7978846, %v304_v12  ;;  %v818_v21 = vadd.f32 %v617_v54, %v754_v16 }
 0x104   :  { %655 = vtanh.f32 %v311_v9  ;;  %v253_v22 = vmul.f32 %v815_v15, %v815_v15  ;;  %v823_v25 = vadd.f32 %v754_v16, %v200_v59  ;;  %v826_v26 = vadd.f32 %v754_v16, %v232_v60 }
 0x105   :  { %657 = vtanh.f32 %v319_v10  ;;  %v261_v27 = vmul.f32 %v818_v21, %v818_v21  ;;  %v831_v28 = vadd.f32 %v610_v1, %v754_v16  ;;  %v834_v31 = vadd.f32 %v618_v2, %v754_v16 }
 0x106   :  { %659 = vtanh.f32 %v314_v13  ;;  %v269_v32 = vmul.f32 %v253_v22, %v815_v15  ;;  %v251_v33 = vmul.f32 %v823_v25, %v823_v25  ;;  %v259_v34 = vmul.f32 %v826_v26, %v826_v26 }
 0x107   :  { %661 = vtanh.f32 %v322_v14  ;;  %v277_v37 = vmul.f32 %v261_v27, %v818_v21  ;;  %v254_v38 = vmul.f32 %v831_v28, %v831_v28  ;;  %v262_v39 = vmul.f32 %v834_v31, %v834_v31 }
 0x108   :  { %663 = vtanh.f32 %v312_v17  ;;  %v285_v40 = vmul.f32 0.044715, %v269_v32  ;;  %v267_v41 = vmul.f32 %v251_v33, %v823_v25  ;;  %v275_v42 = vmul.f32 %v259_v34, %v826_v26 }
 0x109   :  { %665 = vtanh.f32 %v320_v18  ;;  %v293_v43 = vmul.f32 0.044715, %v277_v37  ;;  %v270_v44 = vmul.f32 %v254_v38, %v831_v28  ;;  %v278_v45 = vmul.f32 %v262_v39, %v834_v31 }
 0x10a   :  { %v301_v46 = vadd.f32 %v285_v40, %v815_v15  ;;  %v283_v47 = vmul.f32 0.044715, %v267_v41  ;;  %v291_v48 = vmul.f32 0.044715, %v275_v42  ;;  %v854_v55 = vadd.f32 %v754_v16, %v203_v7 }
 0x10b   :  { %v309_v49 = vadd.f32 %v293_v43, %v818_v21  ;;  %v286_v50 = vmul.f32 0.044715, %v270_v44  ;;  %v294_v51 = vmul.f32 0.044715, %v278_v45  ;;  %v863_v12 = vadd.f32 %v754_v16, %v810_v8 }
 0x10c   :  { %v652_v52 = vpop.eup %651  ;;  %v317_v53 = vmul.f32 0.7978846, %v301_v46  ;;  %v299_v54 = vadd.f32 %v283_v47, %v823_v25  ;;  %v307_v0 = vadd.f32 %v291_v48, %v826_v26  ;;  %v252_v7 = vmul.f32 %v854_v55, %v854_v55 }
 0x10d   :  { %v654_v56 = vpop.eup %653  ;;  %v345_v57 = vadd.f32 1.0, %v652_v52  ;;  %v325_v58 = vmul.f32 0.7978846, %v309_v49  ;;  %v302_v59 = vadd.f32 %v286_v50, %v831_v28  ;;  %v310_v60 = vadd.f32 %v294_v51, %v834_v31 }
 0x10e   :  { %v656_v61 = vpop.eup %655  ;;  %v353_v62 = vadd.f32 1.0, %v654_v56  ;;  %667 = vtanh.f32 %v317_v53  ;;  %v315_v63 = vmul.f32 0.7978846, %v299_v54  ;;  %v323_v18 = vmul.f32 0.7978846, %v307_v0 }
 0x10f   :  { %v658_v1 = vpop.eup %657  ;;  %v343_v2 = vadd.f32 1.0, %v656_v61  ;;  %669 = vtanh.f32 %v325_v58  ;;  %v318_v3 = vmul.f32 0.7978846, %v302_v59  ;;  %v326_v6 = vmul.f32 0.7978846, %v310_v60 }
 0x110   :  { %v660_v4 = vpop.eup %659  ;;  %v351_v5 = vadd.f32 1.0, %v658_v1  ;;  %v361_v10 = vmul.f32 0.5, %v345_v57  ;;  %671 = vtanh.f32 %v315_v63  ;;  %v369_v14 = vmul.f32 0.5, %v353_v62 }
 0x111   :  { %v662_v9 = vpop.eup %661  ;;  %v346_v11 = vadd.f32 1.0, %v660_v4  ;;  %673 = vtanh.f32 %v318_v3  ;;  %v359_v27 = vmul.f32 0.5, %v343_v2  ;;  %v268_v39 = vmul.f32 %v252_v7, %v854_v55 }
 0x112   :  { %v664_v13 = vpop.eup %663  ;;  %v354_v17 = vadd.f32 1.0, %v662_v9  ;;  %675 = vtanh.f32 %v326_v6  ;;  %v367_v34 = vmul.f32 0.5, %v351_v5  ;;  %v377_v40 = vmul.f32 %v361_v10, %v757_v19 }
 0x113   :  { %v666_v22 = vpop.eup %665  ;;  %v362_v32 = vmul.f32 0.5, %v346_v11  ;;  %v344_v33 = vadd.f32 1.0, %v664_v13  ;;  %v260_v41 = vmul.f32 %v863_v12, %v863_v12  ;;  %v385_v42 = vmul.f32 %v369_v14, %v760_v20 }
 0x114   :  { %v370_v37 = vmul.f32 0.5, %v354_v17  ;;  %v352_v38 = vadd.f32 1.0, %v666_v22  ;;  %v284_v45 = vmul.f32 0.044715, %v268_v39  ;;  %v375_v46 = vmul.f32 %v359_v27, %v763_v23 }
 0x115   :  { %v378_v16 = vmul.f32 %v362_v32, %v773_v29  ;;  %v360_v8 = vmul.f32 0.5, %v344_v33  ;;  %v276_v49 = vmul.f32 %v260_v41, %v863_v12  ;;  %v383_v29 = vmul.f32 %v367_v34, %v766_v24 }
 0x116   :  { %v386_v43 = vmul.f32 %v370_v37, %v776_v30  ;;  %v368_v44 = vmul.f32 0.5, %v352_v38  ;;  %v300_v52 = vadd.f32 %v284_v45, %v854_v55  ;;  %677 = vtanh.f32 %v323_v18 }
 0x117   :  { %v532_v47 = vpack.c.bf16 %v378_v16, %v377_v40  ;;  %v376_v48 = vmul.f32 %v360_v8, %v783_v35  ;;  %v292_v53 = vmul.f32 0.044715, %v276_v49 }
 0x118   :  { %v668_v19 = vpop.eup %667  ;;  %v552_v50 = vpack.c.bf16 %v386_v43, %v385_v42  ;;  %v384_v51 = vmul.f32 %v368_v44, %v786_v36  ;;  %v316_v54 = vmul.f32 0.7978846, %v300_v52 }
 0x119   :  { %v670_v20 = vpop.eup %669  ;;  %564 = vst [vmem:[%s914_s3 + $0x8] sm:$0xff] %v532_v47   ;;  %v527_v30 = vpack.c.bf16 %v376_v48, %v375_v46  ;;  %v349_v23 = vadd.f32 1.0, %v668_v19  ;;  %v308_v36 = vadd.f32 %v292_v53, %v863_v12 }
 0x11a   :  { %568 = vst [vmem:[%s914_s3 + $0x28] sm:$0xff] %v552_v50   ;;  %v547_v35 = vpack.c.bf16 %v384_v51, %v383_v29  ;;  %v357_v24 = vadd.f32 1.0, %v670_v20  ;;  %v672_v56 = vpop.eup %671  ;;  %679 = vtanh.f32 %v316_v54 }
 0x11b   :  { %528 = vst [vmem:[%s914_s3] sm:$0xff] %v527_v30   ;;  %v674_v57 = vpop.eup %673  ;;  %v365_v59 = vmul.f32 0.5, %v349_v23  ;;  %v324_v61 = vmul.f32 0.7978846, %v308_v36  ;;  %v347_v7 = vadd.f32 1.0, %v672_v56 }
 0x11c   :  { %567 = vst [vmem:[%s914_s3 + $0x20] sm:$0xff] %v547_v35   ;;  %v676_v58 = vpop.eup %675  ;;  %v350_v60 = vadd.f32 1.0, %v674_v57  ;;  %v373_v62 = vmul.f32 0.5, %v357_v24 }
 0x11d   :  { %v358_v63 = vadd.f32 1.0, %v676_v58  ;;  %681 = vtanh.f32 %v324_v61  ;;  %v381_v2 = vmul.f32 %v365_v59, %v815_v15  ;;  %v363_v15 = vmul.f32 0.5, %v347_v7 }
 0x11e   :  { %v366_v0 = vmul.f32 0.5, %v350_v60  ;;  %v389_v4 = vmul.f32 %v373_v62, %v818_v21 }
 0x11f   :  { %v374_v1 = vmul.f32 0.5, %v358_v63  ;;  %v379_v18 = vmul.f32 %v363_v15, %v823_v25 }
 0x120   :  { %v382_v3 = vmul.f32 %v366_v0, %v831_v28  ;;  %v678_v6 = vpop.eup %677 }
 0x121   :  { %v390_v5 = vmul.f32 %v374_v1, %v834_v31  ;;  %v355_v13 = vadd.f32 1.0, %v678_v6 }
 0x122   :  { %v542_v9 = vpack.c.bf16 %v382_v3, %v381_v2 }
 0x123   :  { %v562_v10 = vpack.c.bf16 %v390_v5, %v389_v4  ;;  %v371_v17 = vmul.f32 0.5, %v355_v13 }
 0x124   :  { %566 = vst [vmem:[%s914_s3 + $0x18] sm:$0xff] %v542_v9   ;;  %v680_v11 = vpop.eup %679 }
 0x125   :  { %570 = vst [vmem:[%s914_s3 + $0x38] sm:$0xff] %v562_v10   ;;  %v348_v28 = vadd.f32 1.0, %v680_v11  ;;  %v387_v33 = vmul.f32 %v371_v17, %v826_v26 }
 0x127   :  { %v682_v14 = vpop.eup %681  ;;  %v364_v21 = vmul.f32 0.5, %v348_v28 }
 0x128   :  { %v356_v31 = vadd.f32 1.0, %v682_v14 }
 0x129   :  { %v380_v22 = vmul.f32 %v364_v21, %v854_v55 }
 0x12a   :  { %v372_v27 = vmul.f32 0.5, %v356_v31 }
 0x12b   :  { %v537_v32 = vpack.c.bf16 %v380_v22, %v379_v18 }
 0x12c   :  { %v388_v34 = vmul.f32 %v372_v27, %v863_v12 }
 0x12d   :  { %565 = vst [vmem:[%s914_s3 + $0x10] sm:$0xff] %v537_v32  }
 0x12e   :  { %v557_v37 = vpack.c.bf16 %v388_v34, %v387_v33 }
 0x130   :  { %569 = vst [vmem:[%s914_s3 + $0x30] sm:$0xff] %v557_v37  }

// kernel: patch_embed_forward.3
= control target key start
LH: loop header
LB: loop body
LE: loop exit
PB: predicated region body
PF: predicated region fallthrough
CT: control target
= control target key end

     0   :  { %s1024_s0 = inlined_call_operand.vmem [shape: bf16[32,640], index: 0, kind: input, shape index: {}]   ;;  %s1025_s1 = inlined_call_operand.vmem [shape: bf16[640,128], index: 1, kind: input, shape index: {}]   ;;  %s1026_s2 = inlined_call_operand.vmem [shape: f32[1,128], index: 2, kind: input, shape index: {}]   ;;  %s1027_s3 = inlined_call_operand.hbm [shape: f32[32,128], index: 3, kind: output, shape index: {}]  }
   0x1   :  { %v750_v0 = vld [vmem:[%s1025_s1 + $0x40] sm:$0xff]   ;;  %v754_v4 = vld [vmem:[%s1025_s1 + $0x48] sm:$0xff]   ;;  %v758_v8 = vld [vmem:[%s1025_s1 + $0x50] sm:$0xff]  }
   0x2   :  { %v751_v1 = vld [vmem:[%s1025_s1] sm:$0xff]   ;;  %661 = vmatprep.subr.bf16.mxu0 %v750_v0  ;;  %v755_v5 = vld [vmem:[%s1025_s1 + $0x8] sm:$0xff]   ;;  %v759_v9 = vld [vmem:[%s1025_s1 + $0x10] sm:$0xff]  }
   0x3   :  { %v752_v2 = vld [vmem:[%s1025_s1 + $0xc0] sm:$0xff]   ;;  %662 = vmatpush3.bf16.msra.mxu0 %v751_v1  ;;  %v756_v6 = vld [vmem:[%s1025_s1 + $0xc8] sm:$0xff]   ;;  %v760_v10 = vld [vmem:[%s1025_s1 + $0xd0] sm:$0xff]  }
   0x4   :  { %v753_v3 = vld [vmem:[%s1025_s1 + $0x80] sm:$0xff]   ;;  %689 = vmatprep.subr.bf16.mxu1 %v752_v2  ;;  %663 = vmatprep.subr.bf16.mxu0 %v754_v4  ;;  %v757_v7 = vld [vmem:[%s1025_s1 + $0x88] sm:$0xff]   ;;  %v761_v11 = vld [vmem:[%s1025_s1 + $0x90] sm:$0xff]  }
   0x5   :  { %690 = vmatpush3.bf16.msra.mxu1 %v753_v3  ;;  %v762_v12 = vld [vmem:[%s1025_s1 + $0x58] sm:$0xff]   ;;  %v766_v16 = vld [vmem:[%s1025_s1 + $0x60] sm:$0xff]   ;;  %v770_v20 = vld [vmem:[%s1025_s1 + $0x68] sm:$0xff]  }
   0x6   :  { %691 = vmatprep.subr.bf16.mxu1 %v756_v6  ;;  %v763_v13 = vld [vmem:[%s1025_s1 + $0x18] sm:$0xff]   ;;  %v767_v17 = vld [vmem:[%s1025_s1 + $0x20] sm:$0xff]   ;;  %v771_v21 = vld [vmem:[%s1025_s1 + $0x28] sm:$0xff]  }
   0x7   :  { %664 = vmatpush3.bf16.msra.mxu0 %v755_v5  ;;  %v764_v14 = vld [vmem:[%s1025_s1 + $0xd8] sm:$0xff]   ;;  %v768_v18 = vld [vmem:[%s1025_s1 + $0xe0] sm:$0xff]   ;;  %v772_v22 = vld [vmem:[%s1025_s1 + $0xe8] sm:$0xff]  }
   0x8   :  { %665 = vmatprep.subr.bf16.mxu0 %v758_v8  ;;  %v765_v15 = vld [vmem:[%s1025_s1 + $0x98] sm:$0xff]   ;;  %v769_v19 = vld [vmem:[%s1025_s1 + $0xa0] sm:$0xff]   ;;  %v773_v23 = vld [vmem:[%s1025_s1 + $0xa8] sm:$0xff]  }
   0x9   :  { %692 = vmatpush3.bf16.msra.mxu1 %v757_v7  ;;  %v774_v24 = vld [vmem:[%s1025_s1 + $0x70] sm:$0xff]   ;;  %v778_v28 = vld [vmem:[%s1025_s1 + $0x78] sm:$0xff]   ;;  %v785_v34 = vld [vmem:[%s1025_s1 + $0x100] sm:$0xff]  }
   0xa   :  { %693 = vmatprep.subr.bf16.mxu1 %v760_v10  ;;  %v775_v25 = vld [vmem:[%s1025_s1 + $0x30] sm:$0xff]   ;;  %v779_v29 = vld [vmem:[%s1025_s1 + $0x38] sm:$0xff]   ;;  %v788_v36 = vld [vmem:[%s1024_s0 + $0xc] ss:$20 sps:$4 sm:$0xff]  }
   0xb   :  { %666 = vmatpush3.bf16.msra.mxu0 %v759_v9  ;;  %v776_v26 = vld [vmem:[%s1025_s1 + $0xf0] sm:$0xff]   ;;  %v780_v30 = vld [vmem:[%s1025_s1 + $0xf8] sm:$0xff]   ;;  %v789_v37 = vld [vmem:[%s1025_s1 + $0x108] sm:$0xff]   ;;  %488 = vmatprep.mubr.bf16.mxu1 %v788_v36 }
   0xc   :  { %667 = vmatprep.subr.bf16.mxu0 %v762_v12  ;;  %v777_v27 = vld [vmem:[%s1025_s1 + $0xb0] sm:$0xff]   ;;  %v783_v32 = vld [vmem:[%s1024_s0 + $0x4] ss:$20 sps:$4 sm:$0xff]   ;;  %v786_v35 = vld [vmem:[%s1024_s0 + $0x8] ss:$20 sps:$4 sm:$0xff]  }
   0xd   :  { %694 = vmatpush3.bf16.msra.mxu1 %v761_v11  ;;  %v781_v31 = vld [vmem:[%s1024_s0] ss:$20 sps:$4 sm:$0xff]   ;;  %v784_v33 = vld [vmem:[%s1025_s1 + $0xb8] sm:$0xff]   ;;  %439 = vmatprep.mubr.bf16.mxu0 %v783_v32  ;;  %v799_v43 = vld [vmem:[%s1024_s0 + $0x30] ss:$20 sps:$4 sm:$0xff]  }
   0xe   :  { %695 = vmatprep.subr.bf16.mxu1 %v764_v14  ;;  %v790_v38 = vld [vmem:[%s1025_s1 + $0x110] sm:$0xff]   ;;  %v793_v39 = vld [vmem:[%s1024_s0 + $0x2c] ss:$20 sps:$4 sm:$0xff]   ;;  %v791_v40 = vld [vmem:[%s1025_s1 + $0x118] sm:$0xff]  }
   0xf   :  { %668 = vmatpush3.bf16.msra.mxu0 %v763_v13  ;;  %v796_v41 = vld [vmem:[%s1024_s0 + $0x28] ss:$20 sps:$4 sm:$0xff]   ;;  %v792_v44 = vld [vmem:[%s1025_s1 + $0x120] sm:$0xff]  }
  0x10   :  { %669 = vmatprep.subr.bf16.mxu0 %v766_v16  ;;  %v797_v42 = vld [vmem:[%s1024_s0 + $0x34] ss:$20 sps:$4 sm:$0xff]   ;;  %v802_v45 = vld [vmem:[%s1024_s0 + $0x10] ss:$20 sps:$4 sm:$0xff]  }
  0x11   :  { %696 = vmatpush3.bf16.msra.mxu1 %v765_v15 }
  0x12   :  { %697 = vmatprep.subr.bf16.mxu1 %v768_v18 }
  0x13   :  { %670 = vmatpush3.bf16.msra.mxu0 %v767_v17 }
  0x14   :  { %671 = vmatprep.subr.bf16.mxu0 %v770_v20 }
  0x15   :  { %698 = vmatpush3.bf16.msra.mxu1 %v769_v19 }
  0x16   :  { %699 = vmatprep.subr.bf16.mxu1 %v772_v22 }
  0x17   :  { %672 = vmatpush3.bf16.msra.mxu0 %v771_v21 }
  0x18   :  { %673 = vmatprep.subr.bf16.mxu0 %v774_v24 }
  0x19   :  { %700 = vmatpush3.bf16.msra.mxu1 %v773_v23 }
  0x1a   :  { %701 = vmatprep.subr.bf16.mxu1 %v776_v26 }
  0x1b   :  { %674 = vmatpush3.bf16.msra.mxu0 %v775_v25 }
  0x1c   :  { %675 = vmatprep.subr.bf16.mxu0 %v778_v28 }
  0x1d   :  { %702 = vmatpush3.bf16.msra.mxu1 %v777_v27 }
  0x1e   :  { %703 = vmatprep.subr.bf16.mxu1 %v780_v30 }
  0x1f   :  { %676 = vmatpush3.bf16.msra.mxu0 %v779_v29 }
  0x20   :  { %727 = vmatprep.subr.bf16.mxu0 %v785_v34 }
  0x21   :  { %704 = vmatpush3.bf16.msra.mxu1 %v784_v33 }
  0x22   :  { %440 = vmatmul.mubr.bf16.vlgmr.msra.gmra.mrb[0].mxu0 %v781_v31 }
  0x23   :  { %728 = vmatpush3.bf16.msra.mxu0 %v785_v34  ;;  %447 = vmatprep.mubr.bf16.mxu0 %v793_v39 }
  0x24   :  { %489 = vmatmul.mubr.bf16.vlgmr.msra.gmra.mrb[0].mxu1 %v786_v35  ;;  %729 = vmatprep.subr.bf16.mxu0 %v789_v37 }
  0x25   :  { %496 = vmatprep.mubr.bf16.mxu1 %v797_v42 }
  0x27   :  { %730 = vmatpush3.bf16.msra.mxu0 %v789_v37 }
  0x28   :  { %731 = vmatprep.subr.bf16.mxu0 %v790_v38 }
  0x2a   :  { %448 = vmatmul.mubr.bf16.gmra.mrb[4].mxu0 %v796_v41 }
  0x2b   :  { %732 = vmatpush3.bf16.msra.mxu0 %v790_v38 }
  0x2c   :  { %733 = vmatprep.subr.bf16.mxu0 %v791_v40  ;;  %497 = vmatmul.mubr.bf16.gmra.mrb[4].mxu1 %v799_v43 }
  0x2d   :  { %8 = vsyncpa [#allocation3], 0  ;;  %743 = vmatprep.mubr.bf16.mxu0 %v802_v45  ;;  %v795_v46 = vld [vmem:[%s1025_s1 + $0x128] sm:$0xff]   ;;  %v800_v47 = vld [vmem:[%s1025_s1 + $0x130] sm:$0xff]  }
  0x2e   :  { %v801_v48 = vld [vmem:[%s1025_s1 + $0x138] sm:$0xff]   ;;  %v610_v51 = vld [vmem:[%s1026_s2] ss:$0 sm:$0xff] }
  0x2f   :  { %734 = vmatpush3.bf16.msra.mxu0 %v791_v40  ;;  %v803_v49 = vld [vmem:[%s1024_s0 + $0x38] ss:$20 sps:$4 sm:$0xff]   ;;  %s836_s0 = smov [#allocation2]  }
  0x30   :  { %735 = vmatprep.subr.bf16.mxu0 %v792_v44  ;;  %s599_s1 = sshll.u32 %s836_s0, 4  ;;  %s600_s1 = int_to_ptr.vmem [resolvable:$true] %s599_s1 }
  0x31   :  { %s812_s2 = scalar_lea.vmem %s600_s1, 512  ;;  %p817_p1 = scmp.lt.s32.totalorder %s600_s1, %s600_s1 }
  0x32   :  { %p813_p0 = scmp.ne.s32.totalorder %s600_s1, %s812_s2  ;;  %p818_p2 = scmp.lt.s32.totalorder %s812_s2, %s812_s2 }
  0x33   :  { %736 = vmatpush3.bf16.msra.mxu0 %v792_v44 }
  0x34   :  { %737 = vmatprep.subr.bf16.mxu0 %v795_v46  ;;  %p819_p3 = por %p818_p2, %p817_p1 }
  0x36   :  { %p820_p4 = pnand %p819_p3, %p813_p0 }
  0x37   :  { %738 = vmatpush3.bf16.msra.mxu0 %v795_v46 }
  0x38   :  { %739 = vmatprep.subr.bf16.mxu0 %v800_v47 }
  0x3b   :  { %740 = vmatpush3.bf16.msra.mxu0 %v800_v47 }
  0x3c   :  { %741 = vmatprep.subr.bf16.mxu0 %v801_v48 }
  0x3f   :  { %742 = vmatpush3.bf16.msra.mxu0 %v801_v48 }
  0x42   :  { %744 = vmatmul.mubr.bf16.vlgmr.msra.gmra.mrb[8].mxu0 %v803_v49 }
  0xf5   :  { %v677_v50 = vpop.f32.mrb[0].mxu0 }
  0xf6   :  { %v678_v52 = vpop.f32.mrb[1].mxu0 }
  0xf7   :  { %v679_v53 = vadd.f32 %v678_v52, %v677_v50  ;;  %v680_v54 = vpop.f32.mrb[2].mxu0  ;;  %v705_v55 = vpop.f32.mrb[0].mxu1 }
  0xf8   :  { %v681_v56 = vpop.f32.mrb[3].mxu0  ;;  %v706_v59 = vpop.f32.mrb[1].mxu1 }
  0xf9   :  { %v442_v57 = vadd.f32 %v679_v53, %v610_v51  ;;  %v682_v58 = vadd.f32 %v681_v56, %v680_v54  ;;  %v707_v60 = vadd.f32 %v706_v59, %v705_v55  ;;  %v708_v61 = vpop.f32.mrb[2].mxu1 }
  0xfa   :  { %v709_v63 = vpop.f32.mrb[3].mxu1 }
  0xfb   :  { %v445_v62 = vadd.f32 %v682_v58, %v610_v51  ;;  %v710_v0 = vadd.f32 %v709_v63, %v708_v61  ;;  %v491_v1 = vadd.f32 %v707_v60, %v442_v57 }
  0xfd   :  { %v683_v2 = vpop.f32.mrb[4].mxu0  ;;  %v494_v4 = vadd.f32 %v710_v0, %v445_v62 }
  0xfe   :  { %v684_v3 = vpop.f32.mrb[5].mxu0 }
  0xff   :  { %v685_v5 = vadd.f32 %v684_v3, %v683_v2  ;;  %v686_v6 = vpop.f32.mrb[6].mxu0  ;;  %v711_v7 = vpop.f32.mrb[4].mxu1 }
 0x100   :  { %v687_v8 = vpop.f32.mrb[7].mxu0  ;;  %v712_v11 = vpop.f32.mrb[5].mxu1 }
 0x101   :  { %v450_v9 = vadd.f32 %v685_v5, %v610_v51  ;;  %v688_v10 = vadd.f32 %v687_v8, %v686_v6  ;;  %v713_v12 = vadd.f32 %v712_v11, %v711_v7  ;;  %v714_v13 = vpop.f32.mrb[6].mxu1 }
 0x102   :  { %v715_v15 = vpop.f32.mrb[7].mxu1 }
 0x103   :  { %v453_v14 = vadd.f32 %v688_v10, %v610_v51  ;;  %v716_v16 = vadd.f32 %v715_v15, %v714_v13  ;;  %v499_v17 = vadd.f32 %v713_v12, %v450_v9 }
 0x105   :  { %v502_v18 = vadd.f32 %v716_v16, %v453_v14 }
 0x115   :  { %v745_v19 = vpop.f32.mrb[8].mxu0 }
 0x116   :  { %v548_v20 = vadd.f32 %v745_v19, %v499_v17  ;;  %v539_v21 = vpop.f32.mrb[9].mxu0 }
 0x117   :  { %v540_v22 = vadd.f32 %v539_v21, %v491_v1  ;;  %v746_v23 = vpop.f32.mrb[10].mxu0 }
 0x118   :  { %v556_v24 = vmul.f32 %v548_v20, %v548_v20  ;;  %v551_v25 = vadd.f32 %v746_v23, %v502_v18  ;;  %v542_v26 = vpop.f32.mrb[11].mxu0 }
 0x119   :  { %v554_v27 = vmul.f32 %v540_v22, %v540_v22  ;;  %v543_v28 = vadd.f32 %v542_v26, %v494_v4 }
 0x11a   :  { %v560_v29 = vmul.f32 %v556_v24, %v548_v20  ;;  %v557_v30 = vmul.f32 %v551_v25, %v551_v25 }
 0x11b   :  { %v558_v31 = vmul.f32 %v554_v27, %v540_v22  ;;  %v555_v32 = vmul.f32 %v543_v28, %v543_v28 }
 0x11c   :  { %v564_v33 = vmul.f32 0.044715, %v560_v29  ;;  %v561_v34 = vmul.f32 %v557_v30, %v551_v25 }
 0x11d   :  { %v562_v35 = vmul.f32 0.044715, %v558_v31  ;;  %v559_v36 = vmul.f32 %v555_v32, %v543_v28 }
 0x11e   :  { %v568_v37 = vadd.f32 %v564_v33, %v548_v20  ;;  %v565_v38 = vmul.f32 0.044715, %v561_v34 }
 0x11f   :  { %v566_v39 = vadd.f32 %v562_v35, %v540_v22  ;;  %v563_v40 = vmul.f32 0.044715, %v559_v36 }
 0x120   :  { %v572_v41 = vmul.f32 0.7978846, %v568_v37  ;;  %v569_v42 = vadd.f32 %v565_v38, %v551_v25 }
 0x121   :  { %v570_v43 = vmul.f32 0.7978846, %v566_v39  ;;  %v567_v44 = vadd.f32 %v563_v40, %v543_v28 }
 0x122   :  { %804 = vtanh.f32 %v572_v41  ;;  %v573_v45 = vmul.f32 0.7978846, %v569_v42 }
 0x123   :  { %806 = vtanh.f32 %v570_v43  ;;  %v571_v46 = vmul.f32 0.7978846, %v567_v44 }
 0x124   :  { %808 = vtanh.f32 %v573_v45 }
 0x125   :  { %810 = vtanh.f32 %v571_v46 }
 0x12c   :  { %v805_v47 = vpop.eup %804 }
 0x12d   :  { %v807_v48 = vpop.eup %806  ;;  %v580_v49 = vadd.f32 1.0, %v805_v47 }
 0x12e   :  { %v809_v50 = vpop.eup %808  ;;  %v578_v51 = vadd.f32 1.0, %v807_v48 }
 0x12f   :  { %v811_v52 = vpop.eup %810  ;;  %v584_v53 = vmul.f32 0.5, %v580_v49  ;;  %v581_v54 = vadd.f32 1.0, %v809_v50 }
 0x130   :  { %v582_v55 = vmul.f32 0.5, %v578_v51  ;;  %v579_v56 = vadd.f32 1.0, %v811_v52 }
 0x131   :  { %v588_v57 = vmul.f32 %v584_v53, %v548_v20  ;;  %v585_v58 = vmul.f32 0.5, %v581_v54 }
 0x132   :  { %v586_v59 = vmul.f32 %v582_v55, %v540_v22  ;;  %v583_v60 = vmul.f32 0.5, %v579_v56 }
 0x133   :  { %592 = vst [vmem:[#allocation2 + $0x10] sm:$0xff] %v588_v57  ;;  %v589_v61 = vmul.f32 %v585_v58, %v551_v25 }
 0x134   :  { %590 = vst [vmem:[#allocation2] sm:$0xff] %v586_v59  ;;  %v587_v62 = vmul.f32 %v583_v60, %v543_v28 }
 0x135   :  { %593 = vst [vmem:[#allocation2 + $0x18] sm:$0xff] %v589_v61 }
 0x136   :  { %591 = vst [vmem:[#allocation2 + $0x8] sm:$0xff] %v587_v62 }
 0x137   :  { %823 = shalt.err (!%p820_p4)
}
 0x138   :  { %s824_s8 = scalar_lea.hbm %s1027_s3, 512 }
 0x139   :  { %p825_p5 = scmp.ne.s32.totalorder %s1027_s3, %s824_s8  ;;  %p828_p6 = scmp.lt.u32.totalorder %s824_s8, %s1027_s3 }
 0x13b   :  { %p830_p7 = pnand %p828_p6, %p825_p5 }
 0x13d   :  { %833 = shalt.err (!%p830_p7)
}
 0x13e   :  { %s837_s13 = smov 128   ;;  %s838_s14 = smov 8  }
 0x13f   :  { %605 = dma.vmem_to_hbm [thread:$0]  %s600_s1, 512, %s1027_s3, [#allocation3], %s837_s13, %s837_s13, %s838_s14  }
 0x140   :  { %834 = dma.done.wait [#allocation3], 512  }
 0x141   :  { %835 = vsyncadd [#allocation3], 4294966784 }
 0x142   :  { %609 = vsyncpa [#allocation3], 1 }

</bundles_post_ra>
